<compile_context>
chip_gen: v5e
topology: v5e:2x2
jax: 0.10.0
libtpu: 0.0.40
codegen_flags: <defaults>
</compile_context>

<pallas_src>
import jax
import jax.numpy as jnp
from jax.experimental import pallas as pl
from jax.experimental.pallas import tpu as pltpu

# ----- config (small, consistent with the module's __init__) -----------------
SEQ_LEN = 16          # configs.seq_len   (context_window)
PRED_LEN = 8          # configs.pred_len  (target_window)
ENC_IN = 4            # configs.enc_in    (nvars)
D_MODEL = 32          # configs.d_model
KERNEL_SIZE = 3       # configs.kernel_size
STRIDE = 1            # configs.stride
D4 = D_MODEL // 4


def conv_out_len(length_in, kernel_size, stride=1, padding=0, dilation=1):
    return (length_in + 2 * padding - dilation * (kernel_size - 1) - 1) // stride + 1


L1 = conv_out_len(SEQ_LEN, KERNEL_SIZE, STRIDE)    # after embedding1
L2 = conv_out_len(L1, KERNEL_SIZE, STRIDE)         # after embedding2 (conv_out_len)
K_EFF = (KERNEL_SIZE - 1) * STRIDE + KERNEL_SIZE   # receptive field of conv2∘conv1
IN_FEATS = ENC_IN * SEQ_LEN                        # 64 effective input features


# ----- Pallas kernel: one lane-dense affine matmul per batch tile -------------
def _affine_kernel(w_ref, b_ref, x_ref, o_ref):
    # w: (PRED_LEN, IN_FEATS)  b: (PRED_LEN, 1)  x: (IN_FEATS, B_TILE)
    # o: (PRED_LEN, B_TILE)  — batch on the lane axis, unmasked vector stores.
    o_ref[...] = (
        jnp.dot(w_ref[...], x_ref[...], preferred_element_type=jnp.float32)
        + b_ref[...]
    )


# ----- exact parameter folding (batch-independent, done once) -----------------
def fold_params(w1, b1, w2, b2, dw, db):
    """Compose conv1 ∘ conv2 ∘ flatten ∘ linear into W_eff, b_eff (exact)."""
    # conv2 ∘ conv1:  h2[m,t] = sum_{c,r} w12[m,c,r] * x[c, t*s^2 + r] + b12[m]
    w12 = jnp.zeros((D_MODEL, ENC_IN, K_EFF), jnp.float32)
    for j in range(KERNEL_SIZE):
        for k in range(KERNEL_SIZE):
            w12 = w12.at[:, :, j * STRIDE + k].add(
                jnp.einsum('ma,ac->mc', w2[:, :, j], w1[:, :, k]))
    b12 = b2 + jnp.einsum('maj,a->m', w2, b1)

    # decoder over Flatten(start_dim=-2): flat index = m*L2 + t (torch order)
    dw3 = dw.reshape(PRED_LEN, D_MODEL, L2)
    s2 = STRIDE * STRIDE
    w_eff = jnp.zeros((PRED_LEN, ENC_IN, SEQ_LEN), jnp.float32)
    for t in range(L2):
        for r in range(K_EFF):
            w_eff = w_eff.at[:, :, t * s2 + r].add(
                jnp.einsum('pm,mc->pc', dw3[:, :, t], w12[:, :, r]))
    b_eff = db + jnp.einsum('pmt,m->p', dw3, b12)

    # flat feature index = c*SEQ_LEN + pos  (matches x_ncw.reshape(B, C*L))
    return w_eff.reshape(PRED_LEN, IN_FEATS), b_eff.reshape(PRED_LEN, 1)


def model_forward(x, w1, b1, w2, b2, dw, db):
    """x: (B, SEQ_LEN, ENC_IN) — same as the PyTorch forward's input."""
    B = x.shape[0]
    w_eff, b_eff = fold_params(w1, b1, w2, b2, dw, db)

    # glue: permute(0,2,1) -> NCW, flatten to feature rows, batch on lanes.
    x_ncw = jnp.transpose(x, (0, 2, 1)).astype(jnp.float32)   # (B, C, L)
    x_cols = x_ncw.reshape(B, IN_FEATS).T                     # (C*L, B)

    # batch tiling: lane axis padded to a multiple of 128, tile up to 1024.
    b_pad0 = max(128, ((B + 127) // 128) * 128)
    b_tile = min(b_pad0, 1024)
    b_pad = ((b_pad0 + b_tile - 1) // b_tile) * b_tile
    x_cols = jnp.pad(x_cols, ((0, 0), (0, b_pad - B)))

    out_pb = pl.pallas_call(
        _affine_kernel,
        out_shape=jax.ShapeDtypeStruct((PRED_LEN, b_pad), jnp.float32),
        grid_spec=pltpu.PrefetchScalarGridSpec(
            num_scalar_prefetch=0,
            grid=(b_pad // b_tile,),
            in_specs=[
                pl.BlockSpec((PRED_LEN, IN_FEATS), lambda g: (0, 0)),
                pl.BlockSpec((PRED_LEN, 1), lambda g: (0, 0)),
                pl.BlockSpec((IN_FEATS, b_tile), lambda g: (0, g)),
            ],
            out_specs=pl.BlockSpec((PRED_LEN, b_tile), lambda g: (0, g)),
        ),
        compiler_params=pltpu.CompilerParams(
            dimension_semantics=("parallel",)),
    )(w_eff, b_eff, x_cols)

    # wrapper-side layout: (PRED_LEN, B_pad) -> (B, PRED_LEN, 1)
    return out_pb[:, :B].T[:, :, None]


# ----- pure-JAX reference (original layer-by-layer semantics) -----------------
def reference_forward(x, w1, b1, w2, b2, dw, db):
    x_ncw = jnp.transpose(x, (0, 2, 1))
    dn = ("NCH", "OIH", "NCH")
    h1 = jax.lax.conv_general_dilated(
        x_ncw, w1, (STRIDE,), "VALID", dimension_numbers=dn) + b1[None, :, None]
    h2 = jax.lax.conv_general_dilated(
        h1, w2, (STRIDE,), "VALID", dimension_numbers=dn) + b2[None, :, None]
    flat = h2.reshape(h2.shape[0], -1)
    out = flat @ dw.T + db[None, :]
    return out[:, :, None]


if __name__ == "__main__":
    key = jax.random.PRNGKey(0)
    kx, k1, k2, k3, k4, k5, k6 = jax.random.split(key, 7)

    # deterministic synthetic parameters (shapes from Model.__init__)
    w1 = jax.random.normal(k1, (D4, ENC_IN, KERNEL_SIZE), jnp.float32) * 0.1
    b1 = jax.random.normal(k2, (D4,), jnp.float32) * 0.1
    w2 = jax.random.normal(k3, (D_MODEL, D4, KERNEL_SIZE), jnp.float32) * 0.1
    b2 = jax.random.normal(k4, (D_MODEL,), jnp.float32) * 0.1
    dw = jax.random.normal(k5, (PRED_LEN, D_MODEL * L2), jnp.float32) * 0.05
    db = jax.random.normal(k6, (PRED_LEN,), jnp.float32) * 0.05

    # primary small-shape check (B=2) + a multi-tile / padded-lane check
    for B in (2, 1536):
        kb = jax.random.fold_in(kx, B)
        x = jax.random.normal(kb, (B, SEQ_LEN, ENC_IN), jnp.float32)

        out = jax.block_until_ready(model_forward(x, w1, b1, w2, b2, dw, db))
        ref = jax.block_until_ready(reference_forward(x, w1, b1, w2, b2, dw, db))

        assert out.shape == (B, PRED_LEN, 1), out.shape
        err = float(jnp.max(jnp.abs(out - ref)))
        assert err < 2e-4, err

    print("KERNEL_OK")
</pallas_src>

<mosaic_0001>
module attributes {stable_mosaic.version = 11 : i64} {
  func.func @_affine_kernel(%arg0: i32, %arg1: memref<8x64xf32, #tpu.memory_space<vmem>>, %arg2: memref<8x1xf32, #tpu.memory_space<vmem>>, %arg3: memref<64x128xf32, #tpu.memory_space<vmem>>, %arg4: memref<8x128xf32, #tpu.memory_space<vmem>>) attributes {dimension_semantics = [#tpu.dimension_semantics<parallel>], iteration_bounds = array<i64: 1>, scalar_prefetch = 0 : i64, scratch_operands = 0 : i64, tpu.core_type = #tpu.core_type<tc>, window_params = [{pipeline_mode = #tpu.pipeline_mode<synchronous>, transform_indices = @transform_0, window_bounds = array<i64: 8, 64>}, {pipeline_mode = #tpu.pipeline_mode<synchronous>, transform_indices = @transform_1, window_bounds = array<i64: 8, 1>}, {transform_indices = @transform_2, window_bounds = array<i64: 64, 128>}, {transform_indices = @transform_3, window_bounds = array<i64: 8, 128>}]} {
    %c0 = arith.constant 0 : index
    %c0_0 = arith.constant 0 : index
    %0 = vector.load %arg1[%c0, %c0_0] : memref<8x64xf32, #tpu.memory_space<vmem>>, vector<8x64xf32>
    %c0_1 = arith.constant 0 : index
    %c0_2 = arith.constant 0 : index
    %1 = vector.load %arg3[%c0_1, %c0_2] : memref<64x128xf32, #tpu.memory_space<vmem>>, vector<64x128xf32>
    %cst = arith.constant dense<0.000000e+00> : vector<8x128xf32>
    %2 = tpu.matmul %0, %1, %cst {dimension_numbers = #tpu.dot_dimension_numbers<[1], [0], [0], [1], [0, 0, 1, 1], [], []>} : vector<8x64xf32>, vector<64x128xf32>, vector<8x128xf32> -> vector<8x128xf32>
    %c0_3 = arith.constant 0 : index
    %c0_4 = arith.constant 0 : index
    %3 = vector.load %arg2[%c0_3, %c0_4] : memref<8x1xf32, #tpu.memory_space<vmem>>, vector<8x1xf32>
    %4 = vector.broadcast %3 : vector<8x1xf32> to vector<8x128xf32>
    %5 = arith.addf %2, %4 : vector<8x128xf32>
    %c0_5 = arith.constant 0 : index
    %c0_6 = arith.constant 0 : index
    %6 = vector.load %arg4[%c0_5, %c0_6] : memref<8x128xf32, #tpu.memory_space<vmem>>, vector<8x128xf32>
    tpu.vector_store %arg4[%c0_5, %c0_6], %5 {strides = array<i32>} : memref<8x128xf32, #tpu.memory_space<vmem>>, vector<8x128xf32>,
    return
  }
  func.func @transform_0(%arg0: i32) -> (i32, i32) {
    %c0_i32 = arith.constant 0 : i32
    %c0_i32_0 = arith.constant 0 : i32
    %c0_i32_1 = arith.constant 0 : i32
    return %c0_i32, %c0_i32_0 : i32, i32
  }
  func.func @transform_1(%arg0: i32) -> (i32, i32) {
    %c0_i32 = arith.constant 0 : i32
    %c0_i32_0 = arith.constant 0 : i32
    %c0_i32_1 = arith.constant 0 : i32
    return %c0_i32, %c0_i32_0 : i32, i32
  }
  func.func @transform_2(%arg0: i32) -> (i32, i32) {
    %c0_i32 = arith.constant 0 : i32
    %c0_i32_0 = arith.constant 0 : i32
    return %c0_i32, %arg0 : i32, i32
  }
  func.func @transform_3(%arg0: i32) -> (i32, i32) {
    %c0_i32 = arith.constant 0 : i32
    %c0_i32_0 = arith.constant 0 : i32
    return %c0_i32, %arg0 : i32, i32
  }
}

</mosaic_0001>

<bundles_post_ra>
// kernel: tpu_custom_call.1
= control target key start
LH: loop header
LB: loop body
LE: loop exit
PB: predicated region body
PF: predicated region fallthrough
CT: control target
= control target key end

     0   :  { %8 = vsyncpa [#allocation3], 0  ;;  %s184_s0 = inlined_call_operand.vmem [shape: f32[8,64], index: 0, kind: input, shape index: {}]   ;;  %s185_s1 = inlined_call_operand.vmem [shape: f32[8,1], index: 1, kind: input, shape index: {}]   ;;  %s186_s2 = inlined_call_operand.hbm [shape: f32[64,128], index: 2, kind: input, shape index: {}]   ;;  %s187_s3 = inlined_call_operand.hbm [shape: f32[8,128], index: 3, kind: output, shape index: {}]  }
   0x1   :  { %9 = vsyncpa [#allocation4], 0  ;;  %s18_s14 = sshll.u32 %s186_s2, 4  ;;  %s147_s15 = smov [#allocation2]   ;;  %s19_s14 = int_to_ptr.hbm [resolvable:$true] %s18_s14 }
   0x2   :  { %s20_s16 = sshll.u32 %s147_s15, 4  ;;  %s148_s17 = smov 128   ;;  %s21_s16 = int_to_ptr.vmem [resolvable:$true] %s20_s16 }
   0x3   :  { %s149_s18 = smov 8  }
   0x4   :  { %26 = dma.hbm_to_vmem [thread:$0]  %s19_s14, 1024, %s21_s16, [#allocation3], %s148_s17, %s148_s17, %s149_s18  }
   0x5   :  { %143 = dma.done.wait [#allocation3], 1024  }
   0x6   :  { %144 = vsyncadd [#allocation3], 4294966272  ;;  %v150_v0 = vmov 0   ;;  %v39_v1 = vld [vmem:[#allocation2 + $0x38] sm:$0xff]  ;;  %v38_v2 = vld [vmem:[#allocation2 + $0x30] sm:$0xff]  ;;  %vm46_vm0 = vcmask 523264  }
   0x7   :  { %94 = vset.pattern.permute.xlu0 %v150_v0  ;;  %58 = vmatpush.msra.mxu0 %v39_v1  ;;  %v37_v3 = vld [vmem:[#allocation2 + $0x28] sm:$0xff]  ;;  %v40_v4 = vld [vmem:[%s185_s1] sm:$0xff]  ;;  %v35_v6 = vld [vmem:[#allocation2 + $0x18] sm:$0xff]  ;;  %s151_s1 = smov [#allocation5]   ;;  %s78_s25 = sshll.u32 %s187_s3, 4  ;;  %s79_s25 = int_to_ptr.hbm [resolvable:$true] %s78_s25 }
   0x8   :  { %v36_v5 = vld [vmem:[#allocation2 + $0x20] sm:$0xff]  ;;  %43 = vperm.xlu0 %94, %v40_v4   ;;  %v34_v7 = vld [vmem:[#allocation2 + $0x10] sm:$0xff]  ;;  %v33_v8 = vld [vmem:[#allocation2 + $0x8] sm:$0xff]  ;;  %s76_s22 = sshll.u32 %s151_s1, 4  ;;  %s77_s22 = int_to_ptr.vmem [resolvable:$true] %s76_s22 }
   0x9   :  { %59 = vmatpush.msra.mxu0 %v38_v2  ;;  %v32_v9 = vld [vmem:[#allocation2] sm:$0xff] }
   0xa   :  { %v31_v10 = vld [vmem:[%s184_s0] sm:$0xff] }
   0xb   :  { %60 = vmatpush.msra.mxu0 %v37_v3 }
   0xd   :  { %61 = vmatpush.msra.mxu0 %v36_v5 }
   0xf   :  { %62 = vmatpush.msra.mxu0 %v35_v6 }
  0x11   :  { %63 = vmatpush.msra.mxu0 %v34_v7 }
  0x13   :  { %64 = vmatpush.msra.mxu0 %v33_v8 }
  0x15   :  { %65 = vmatpush.msra.mxu0 %v32_v9 }
  0x16   :  { %88 = vmatmul.msk.f32.vlgmr.msra.gmra.mxu0 %vm46_vm0, %v31_v10 }
  0x7a   :  { %v44_v11 = vpop.permute.xlu0 %43 }
  0x93   :  { %v67_v12 = vpop.f32.mrf.mxu0 }
  0x94   :  { %v68_v13 = vadd.f32 %v67_v12, %v44_v11 }
  0x96   :  { %70 = vst [vmem:[#allocation5] sm:$0xff] %v68_v13 }
  0x97   :  { %81 = dma.vmem_to_hbm [thread:$0]  %s77_s22, 128, %s79_s25, [#allocation4]  }
  0x98   :  { %145 = dma.done.wait [#allocation4], 128  }
  0x99   :  { %146 = vsyncadd [#allocation4], 4294967168 }
  0x9a   :  { %86 = vsyncpa [#allocation3], 1 }
  0x9b   :  { %87 = vsyncpa [#allocation4], 1 }

</bundles_post_ra>
